<compile_context>
chip_gen: v7x
topology: tpu7x:2x2x1
jax: 0.10.0
libtpu: 0.0.40
codegen_flags: <defaults>
</compile_context>

<pallas_src>
import jax
import jax.numpy as jnp
from jax import lax
from jax.experimental import pallas as pl
from jax.experimental.pallas import tpu as pltpu

RESIZE_HW = (10, 25)           # FeatureResize target size
CROSS_ATTENTION_WEIGHT = 1.0   # QueryFeat default


# ----------------------------------------------------------------------------
# Pallas kernel: one grid step handles a static block of `bb` batches
# ----------------------------------------------------------------------------
def _query_feat_kernel(prop_ref, feat_ref, sel_ref, wkv_ref, bk_ref, qp_ref,
                       out_ref):
    c = wkv_ref.shape[1]
    bb = prop_ref.shape[0]

    sel = sel_ref[...]                       # (HW, S)  constant 0/1 selection
    wkv = wkv_ref[...]                       # (2C, C)  fused key+value weights
    bk = bk_ref[...]                         # (C, 1)   folded key bias (BN)
    qp0, qp1, qp2, qp3 = qp_ref[0], qp_ref[1], qp_ref[2], qp_ref[3]  # (Np, C)

    # Static unroll: bb == 1 (v7x batch-parallel) or bb == B (collapsed grid).
    for bi in range(bb):
        prop = prop_ref[bi]                  # (Np, C) proposal features
        feat = feat_ref[bi]                  # (C, HW) raw feature map, C-first

        # Nearest-resize fused as a selection matmul on the MXU: (C,HW)@(HW,S)
        featsel = jnp.dot(feat, sel, preferred_element_type=jnp.float32)  # (C, S)

        # Fused f_key + f_value 1x1 convs: one (2C,C)@(C,S) matmul.
        kv = jnp.dot(wkv, featsel, preferred_element_type=jnp.float32)    # (2C, S)
        key = jnp.maximum(kv[:c] + bk, 0.0)                               # (C, S)
        value = kv[c:]                                                    # (C, S)

        # f_query: grouped 1x1 conv => per-row scale+bias, ReLU.
        # dim**-0.5 is already folded into qp0/qp1 (ReLU commutes with it).
        q = jnp.maximum(prop * qp0 + qp1, 0.0)                            # (Np, C)

        # Attention scores + softmax (lane dim = S).
        sim = jnp.dot(q, key, preferred_element_type=jnp.float32)         # (Np, S)
        m = jnp.max(sim, axis=-1, keepdims=True)
        e = jnp.exp(sim - m)
        p = e * pl.reciprocal(jnp.sum(e, axis=-1, keepdims=True), approx=False)

        # ctx^T = value @ p^T: contract S, transposing the SMALL (Np,S) operand
        # (not the (C,S) value) — then one tiny (C,Np)->(Np,C) transpose.
        ctx_t = lax.dot_general(value, p, (((1,), (1,)), ((), ())),
                                preferred_element_type=jnp.float32)       # (C, Np)
        ctx = ctx_t.T                                                     # (Np, C)

        # W affine (cross_attention_weight and value-conv bias folded into
        # qp2/qp3), residual add.  Dropout p=0.1 is identity in eval mode.
        out_ref[bi] = (prop + ctx * qp2 + qp3).astype(out_ref.dtype)


# ----------------------------------------------------------------------------
# One-time parameter packing (hoisted out of the per-call path)
# ----------------------------------------------------------------------------
def pack_query_feat_params(params, in_hw, resize_hw=RESIZE_HW,
                           cross_attention_weight=CROSS_ATTENTION_WEIGHT):
    """Precompute everything that does not depend on the activations."""
    H, W = in_hw
    Ho, Wo = resize_hw
    C = params["wk"].shape[0]
    Np = params["wq"].shape[0]
    eps = 1e-5

    # Fold eval-mode BatchNorm into the key conv, fuse key+value weights.
    bn_scale = params["bn_gamma"] / jnp.sqrt(params["bn_var"] + eps)
    wk_fold = params["wk"] * bn_scale[:, None]                       # (C, C)
    bk_fold = (params["bn_beta"] - params["bn_mean"] * bn_scale).reshape(C, 1)
    w_kv = jnp.concatenate([wk_fold, params["wv"]], axis=0)          # (2C, C)

    # Packed per-query params (one DMA instead of four masked (8,1) loads):
    #   [0] f_query scale * dim**-0.5   [1] f_query bias * dim**-0.5
    #   [2] cross_w * W scale           [3] cross_w * (W bias + W scale * bv)
    # (the value-conv bias bv folds into [3] because softmax rows sum to 1)
    dim_scale = C ** -0.5
    cw = cross_attention_weight
    qparams = jnp.stack([
        jnp.broadcast_to(params["wq"] * dim_scale, (Np, C)),
        jnp.broadcast_to(params["bq"] * dim_scale, (Np, C)),
        jnp.broadcast_to(cw * params["ww"], (Np, C)),
        jnp.broadcast_to(cw * (params["bw"] + params["ww"] * params["bv"][None, :]),
                         (Np, C)),
    ], axis=0)                                                       # (4, Np, C)

    # Nearest-resize (PyTorch legacy 'nearest': src = floor(i*H/Ho)) as a
    # constant 0/1 selection matrix (HW, S) applied inside the kernel.
    S = Ho * Wo
    h_idx = (jnp.arange(Ho) * H) // Ho
    w_idx = (jnp.arange(Wo) * W) // Wo
    src = (h_idx[:, None] * W + w_idx[None, :]).reshape(-1)          # (S,)
    sel = jnp.zeros((H * W, S), jnp.float32).at[src, jnp.arange(S)].set(1.0)

    return {"w_kv": w_kv, "bk": bk_fold, "qparams": qparams, "sel": sel}


# ----------------------------------------------------------------------------
# Grid sizing: collapse batch on single-TC chips, batch-parallel on v7x
# ----------------------------------------------------------------------------
def _num_tensorcores_per_chip():
    try:
        kind = jax.devices()[0].device_kind.lower()
        return 2 if "v7" in kind else 1          # v5e/v6e: 1 TC; v7x: 2 TCs
    except Exception:
        return 1


def _batch_block(batch):
    if _num_tensorcores_per_chip() >= 2 and batch > 1 and batch % 2 == 0:
        return 1          # v7x: one batch per grid step, spread across TCs
    # Single-TC (or odd/1 batch): one grid step, unrolled per-batch loop.
    # NOTE(v7x, B==1): an S-split partial-softmax grid would keep the second
    # TC busy; not implemented since batch >= 2 at serve time here.
    return batch


# ----------------------------------------------------------------------------
# Per-call wrapper (lean: one free reshape + one pallas_call)
# ----------------------------------------------------------------------------
def query_feat_forward(packed, prefusion_feature, proposal_features):
    """prefusion_feature: (B, C, H, W) f32;  proposal_features: (B, Np, C) f32."""
    B, C, H, W = prefusion_feature.shape
    _, Np, _ = proposal_features.shape
    HW = H * W
    S = packed["sel"].shape[1]

    feat = prefusion_feature.reshape(B, C, HW)   # free view, channels-first
    bb = _batch_block(B)
    grid = (B // bb,)

    return pl.pallas_call(
        _query_feat_kernel,
        out_shape=jax.ShapeDtypeStruct((B, Np, C), jnp.float32),
        grid_spec=pltpu.PrefetchScalarGridSpec(
            num_scalar_prefetch=0,
            grid=grid,
            in_specs=[
                pl.BlockSpec((bb, Np, C), lambda b: (b, 0, 0)),   # proposals
                pl.BlockSpec((bb, C, HW), lambda b: (b, 0, 0)),   # raw feature map
                pl.BlockSpec((HW, S), lambda b: (0, 0)),          # resize selection
                pl.BlockSpec((2 * C, C), lambda b: (0, 0)),       # fused key+value conv
                pl.BlockSpec((C, 1), lambda b: (0, 0)),           # folded key bias
                pl.BlockSpec((4, Np, C), lambda b: (0, 0, 0)),    # packed per-query params
            ],
            out_specs=pl.BlockSpec((bb, Np, C), lambda b: (b, 0, 0)),
        ),
        compiler_params=pltpu.CompilerParams(
            dimension_semantics=("parallel",)),
    )(proposal_features, feat, packed["sel"], packed["w_kv"], packed["bk"],
      packed["qparams"])


# ----------------------------------------------------------------------------
# Pure-JAX reference (mirrors the PyTorch forward, eval mode)
# ----------------------------------------------------------------------------
def _nearest_resize_to_seq(x, size):
    """F.interpolate(mode='nearest') on NCHW + flatten(2) -> (B, C, S)."""
    B, C, H, W = x.shape
    Ho, Wo = size
    h_idx = (jnp.arange(Ho) * H) // Ho
    w_idx = (jnp.arange(Wo) * W) // Wo
    flat = (h_idx[:, None] * W + w_idx[None, :]).reshape(-1)
    return x.reshape(B, C, H * W)[:, :, flat]


def _reference_forward(params, prefusion_feature, proposal_features):
    B, C, H, W = prefusion_feature.shape
    eps = 1e-5
    hp = lax.Precision.HIGHEST
    # self_attention (FocusedLinearAttention) treated as identity
    query_in = proposal_features
    q = jnp.maximum(query_in * params["wq"][None] + params["bq"][None], 0.0)

    key = jnp.einsum("bchw,dc->bdhw", prefusion_feature, params["wk"], precision=hp)
    scale = params["bn_gamma"] / jnp.sqrt(params["bn_var"] + eps)
    key = (key - params["bn_mean"][None, :, None, None]) * \
        scale[None, :, None, None] + params["bn_beta"][None, :, None, None]
    key = jnp.maximum(key, 0.0)
    key = _nearest_resize_to_seq(key, RESIZE_HW)                     # (B, C, S)

    value = jnp.einsum("bchw,dc->bdhw", prefusion_feature, params["wv"],
                       precision=hp) + params["bv"][None, :, None, None]
    value = _nearest_resize_to_seq(value, RESIZE_HW)                 # (B, C, S)
    value = value.transpose(0, 2, 1)                                 # (B, S, C)

    sim = jnp.einsum("bnc,bcs->bns", q, key, precision=hp) * (C ** -0.5)
    sim = jax.nn.softmax(sim, axis=-1)
    ctx = jnp.einsum("bns,bsc->bnc", sim, value, precision=hp)
    ctx = ctx * params["ww"][None] + params["bw"][None]
    return proposal_features + CROSS_ATTENTION_WEIGHT * ctx


# ----------------------------------------------------------------------------
# Deterministic parameter construction (synthetic, matches __init__ shapes)
# ----------------------------------------------------------------------------
def make_params(rng, num_priors, in_channels):
    ks = jax.random.split(rng, 10)
    C, Np = in_channels, num_priors
    return {
        # f_query: Conv1d(Np, Np, 1, groups=Np) -> weight (Np,1,1), bias (Np,)
        "wq": jax.random.normal(ks[0], (Np, 1), jnp.float32) * 0.5 + 1.0,
        "bq": jax.random.normal(ks[1], (Np, 1), jnp.float32) * 0.1,
        # f_key: ConvModule(C, C, 1, BN) -> conv weight (C,C,1,1) no bias + BN
        "wk": jax.random.normal(ks[2], (C, C), jnp.float32) * (C ** -0.5),
        "bn_gamma": jnp.abs(jax.random.normal(ks[3], (C,), jnp.float32)) + 0.5,
        "bn_beta": jax.random.normal(ks[4], (C,), jnp.float32) * 0.1,
        "bn_mean": jax.random.normal(ks[5], (C,), jnp.float32) * 0.1,
        "bn_var": jnp.abs(jax.random.normal(ks[6], (C,), jnp.float32)) + 0.5,
        # f_value: Conv2d(C, C, 1) with bias
        "wv": jax.random.normal(ks[7], (C, C), jnp.float32) * (C ** -0.5),
        "bv": jnp.linspace(-0.1, 0.1, C, dtype=jnp.float32),
        # W: Conv1d(Np, Np, 1, groups=Np).  __init__ zero-inits it; we use
        # nonzero values here so the test actually exercises the attention path.
        "ww": jax.random.normal(ks[8], (Np, 1), jnp.float32) * 0.5,
        "bw": jax.random.normal(ks[9], (Np, 1), jnp.float32) * 0.1,
    }


if __name__ == "__main__":
    B, C, H, W = 2, 32, 16, 16
    Np = 8

    root = jax.random.PRNGKey(0)
    k_feat, k_prop, k_par = jax.random.split(root, 3)

    prefusion_feature = jax.random.normal(k_feat, (B, C, H, W), jnp.float32)
    proposal_features = jax.random.normal(k_prop, (B, Np, C), jnp.float32)
    params = make_params(k_par, Np, C)

    # One-time setup (hoisted out of the per-call path).
    packed = jax.tree_util.tree_map(jax.block_until_ready,
                                    pack_query_feat_params(params, (H, W)))

    fwd = jax.jit(query_feat_forward)
    out = fwd(packed, prefusion_feature, proposal_features)
    out = jax.block_until_ready(out)

    ref = _reference_forward(params, prefusion_feature, proposal_features)
    assert out.shape == (B, Np, C)
    assert jnp.allclose(out, ref, atol=2e-4, rtol=2e-4), "mismatch vs reference"

    print("KERNEL_OK")
</pallas_src>

<mosaic_0001>
module attributes {stable_mosaic.version = 11 : i64} {
  func.func @_query_feat_kernel(%arg0: i32, %arg1: memref<2x8x32xf32, #tpu.memory_space<vmem>>, %arg2: memref<2x32x256xf32, #tpu.memory_space<vmem>>, %arg3: memref<256x250xf32, #tpu.memory_space<vmem>>, %arg4: memref<64x32xf32, #tpu.memory_space<vmem>>, %arg5: memref<32x1xf32, #tpu.memory_space<vmem>>, %arg6: memref<4x8x32xf32, #tpu.memory_space<vmem>>, %arg7: memref<2x8x32xf32, #tpu.memory_space<vmem>>) attributes {dimension_semantics = [#tpu.dimension_semantics<parallel>], iteration_bounds = array<i64: 1>, scalar_prefetch = 0 : i64, scratch_operands = 0 : i64, tpu.core_type = #tpu.core_type<tc>, window_params = [{transform_indices = @transform_0, window_bounds = array<i64: 2, 8, 32>}, {transform_indices = @transform_1, window_bounds = array<i64: 2, 32, 256>}, {pipeline_mode = #tpu.pipeline_mode<synchronous>, transform_indices = @transform_2, window_bounds = array<i64: 256, 250>}, {pipeline_mode = #tpu.pipeline_mode<synchronous>, transform_indices = @transform_3, window_bounds = array<i64: 64, 32>}, {pipeline_mode = #tpu.pipeline_mode<synchronous>, transform_indices = @transform_4, window_bounds = array<i64: 32, 1>}, {pipeline_mode = #tpu.pipeline_mode<synchronous>, transform_indices = @transform_5, window_bounds = array<i64: 4, 8, 32>}, {transform_indices = @transform_6, window_bounds = array<i64: 2, 8, 32>}]} {
    %c0 = arith.constant 0 : index
    %c0_0 = arith.constant 0 : index
    %0 = vector.load %arg3[%c0, %c0_0] : memref<256x250xf32, #tpu.memory_space<vmem>>, vector<256x250xf32>
    %c0_1 = arith.constant 0 : index
    %c0_2 = arith.constant 0 : index
    %1 = vector.load %arg4[%c0_1, %c0_2] : memref<64x32xf32, #tpu.memory_space<vmem>>, vector<64x32xf32>
    %c0_3 = arith.constant 0 : index
    %c0_4 = arith.constant 0 : index
    %2 = vector.load %arg5[%c0_3, %c0_4] : memref<32x1xf32, #tpu.memory_space<vmem>>, vector<32x1xf32>
    %c0_5 = arith.constant 0 : index
    %c0_6 = arith.constant 0 : index
    %c0_7 = arith.constant 0 : index
    %3 = vector.load %arg6[%c0_5, %c0_6, %c0_7] : memref<4x8x32xf32, #tpu.memory_space<vmem>>, vector<1x8x32xf32>
    %4 = vector.shape_cast %3 : vector<1x8x32xf32> to vector<8x32xf32>
    %c1 = arith.constant 1 : index
    %c0_8 = arith.constant 0 : index
    %c0_9 = arith.constant 0 : index
    %5 = vector.load %arg6[%c1, %c0_8, %c0_9] : memref<4x8x32xf32, #tpu.memory_space<vmem>>, vector<1x8x32xf32>
    %6 = vector.shape_cast %5 : vector<1x8x32xf32> to vector<8x32xf32>
    %c2 = arith.constant 2 : index
    %c0_10 = arith.constant 0 : index
    %c0_11 = arith.constant 0 : index
    %7 = vector.load %arg6[%c2, %c0_10, %c0_11] : memref<4x8x32xf32, #tpu.memory_space<vmem>>, vector<1x8x32xf32>
    %8 = vector.shape_cast %7 : vector<1x8x32xf32> to vector<8x32xf32>
    %c3 = arith.constant 3 : index
    %c0_12 = arith.constant 0 : index
    %c0_13 = arith.constant 0 : index
    %9 = vector.load %arg6[%c3, %c0_12, %c0_13] : memref<4x8x32xf32, #tpu.memory_space<vmem>>, vector<1x8x32xf32>
    %10 = vector.shape_cast %9 : vector<1x8x32xf32> to vector<8x32xf32>
    %c0_14 = arith.constant 0 : index
    %c0_15 = arith.constant 0 : index
    %c0_16 = arith.constant 0 : index
    %11 = vector.load %arg1[%c0_14, %c0_15, %c0_16] : memref<2x8x32xf32, #tpu.memory_space<vmem>>, vector<1x8x32xf32>
    %12 = vector.shape_cast %11 : vector<1x8x32xf32> to vector<8x32xf32>
    %c0_17 = arith.constant 0 : index
    %c0_18 = arith.constant 0 : index
    %c0_19 = arith.constant 0 : index
    %13 = vector.load %arg2[%c0_17, %c0_18, %c0_19] : memref<2x32x256xf32, #tpu.memory_space<vmem>>, vector<1x32x256xf32>
    %14 = vector.shape_cast %13 : vector<1x32x256xf32> to vector<32x256xf32>
    %cst = arith.constant dense<0.000000e+00> : vector<32x250xf32>
    %15 = tpu.matmul %14, %0, %cst {dimension_numbers = #tpu.dot_dimension_numbers<[1], [0], [0], [1], [0, 0, 1, 1], [], []>} : vector<32x256xf32>, vector<256x250xf32>, vector<32x250xf32> -> vector<32x250xf32>
    %cst_20 = arith.constant dense<0.000000e+00> : vector<64x250xf32>
    %16 = tpu.matmul %1, %15, %cst_20 {dimension_numbers = #tpu.dot_dimension_numbers<[1], [0], [0], [1], [0, 0, 1, 1], [], []>} : vector<64x32xf32>, vector<32x250xf32>, vector<64x250xf32> -> vector<64x250xf32>
    %17 = vector.extract_strided_slice %16 {offsets = [0, 0], sizes = [32, 250], strides = [1, 1]} : vector<64x250xf32> to vector<32x250xf32>
    %18 = vector.broadcast %2 : vector<32x1xf32> to vector<32x250xf32>
    %19 = arith.addf %17, %18 : vector<32x250xf32>
    %cst_21 = arith.constant 0.000000e+00 : f32
    %20 = vector.broadcast %cst_21 : f32 to vector<32x250xf32>
    %21 = arith.maximumf %19, %20 : vector<32x250xf32>
    %22 = vector.extract_strided_slice %16 {offsets = [32, 0], sizes = [32, 250], strides = [1, 1]} : vector<64x250xf32> to vector<32x250xf32>
    %23 = arith.mulf %12, %4 : vector<8x32xf32>
    %24 = arith.addf %23, %6 : vector<8x32xf32>
    %cst_22 = arith.constant 0.000000e+00 : f32
    %25 = vector.broadcast %cst_22 : f32 to vector<8x32xf32>
    %26 = arith.maximumf %24, %25 : vector<8x32xf32>
    %cst_23 = arith.constant dense<0.000000e+00> : vector<8x250xf32>
    %27 = tpu.matmul %26, %21, %cst_23 {dimension_numbers = #tpu.dot_dimension_numbers<[1], [0], [0], [1], [0, 0, 1, 1], [], []>} : vector<8x32xf32>, vector<32x250xf32>, vector<8x250xf32> -> vector<8x250xf32>
    %cst_24 = arith.constant dense<0xFF800000> : vector<8xf32>
    %28 = vector.multi_reduction <maximumf>, %27, %cst_24 [1] : vector<8x250xf32> to vector<8xf32>
    %29 = vector.shape_cast %28 : vector<8xf32> to vector<8x1xf32>
    %30 = vector.broadcast %29 : vector<8x1xf32> to vector<8x250xf32>
    %31 = arith.subf %27, %30 : vector<8x250xf32>
    %32 = math.exp %31 : vector<8x250xf32>
    %cst_25 = arith.constant dense<0.000000e+00> : vector<8xf32>
    %33 = vector.multi_reduction <add>, %32, %cst_25 [1] : vector<8x250xf32> to vector<8xf32>
    %34 = vector.shape_cast %33 : vector<8xf32> to vector<8x1xf32>
    %35 = tpu.reciprocal %34 : vector<8x1xf32> -> vector<8x1xf32>
    %36 = vector.broadcast %35 : vector<8x1xf32> to vector<8x250xf32>
    %37 = arith.mulf %32, %36 : vector<8x250xf32>
    %cst_26 = arith.constant dense<0.000000e+00> : vector<32x8xf32>
    %38 = tpu.matmul %22, %37, %cst_26 {dimension_numbers = #tpu.dot_dimension_numbers<[1], [1], [0], [0], [0, 0, 1, 0], [], []>} : vector<32x250xf32>, vector<8x250xf32>, vector<32x8xf32> -> vector<32x8xf32>
    %39 = tpu.transpose %38, [1, 0] : vector<32x8xf32> -> vector<8x32xf32>
    %40 = arith.mulf %39, %8 : vector<8x32xf32>
    %41 = arith.addf %12, %40 : vector<8x32xf32>
    %42 = arith.addf %41, %10 : vector<8x32xf32>
    %c0_27 = arith.constant 0 : index
    %c0_28 = arith.constant 0 : index
    %c0_29 = arith.constant 0 : index
    %43 = vector.load %arg7[%c0_27, %c0_28, %c0_29] : memref<2x8x32xf32, #tpu.memory_space<vmem>>, vector<1x8x32xf32>
    %44 = vector.shape_cast %43 : vector<1x8x32xf32> to vector<8x32xf32>
    %45 = vector.shape_cast %42 : vector<8x32xf32> to vector<1x8x32xf32>
    tpu.vector_store %arg7[%c0_27, %c0_28, %c0_29], %45 {strides = array<i32>} : memref<2x8x32xf32, #tpu.memory_space<vmem>>, vector<1x8x32xf32>,
    %c1_30 = arith.constant 1 : index
    %c0_31 = arith.constant 0 : index
    %c0_32 = arith.constant 0 : index
    %46 = vector.load %arg1[%c1_30, %c0_31, %c0_32] : memref<2x8x32xf32, #tpu.memory_space<vmem>>, vector<1x8x32xf32>
    %47 = vector.shape_cast %46 : vector<1x8x32xf32> to vector<8x32xf32>
    %c1_33 = arith.constant 1 : index
    %c0_34 = arith.constant 0 : index
    %c0_35 = arith.constant 0 : index
    %48 = vector.load %arg2[%c1_33, %c0_34, %c0_35] : memref<2x32x256xf32, #tpu.memory_space<vmem>>, vector<1x32x256xf32>
    %49 = vector.shape_cast %48 : vector<1x32x256xf32> to vector<32x256xf32>
    %cst_36 = arith.constant dense<0.000000e+00> : vector<32x250xf32>
    %50 = tpu.matmul %49, %0, %cst_36 {dimension_numbers = #tpu.dot_dimension_numbers<[1], [0], [0], [1], [0, 0, 1, 1], [], []>} : vector<32x256xf32>, vector<256x250xf32>, vector<32x250xf32> -> vector<32x250xf32>
    %cst_37 = arith.constant dense<0.000000e+00> : vector<64x250xf32>
    %51 = tpu.matmul %1, %50, %cst_37 {dimension_numbers = #tpu.dot_dimension_numbers<[1], [0], [0], [1], [0, 0, 1, 1], [], []>} : vector<64x32xf32>, vector<32x250xf32>, vector<64x250xf32> -> vector<64x250xf32>
    %52 = vector.extract_strided_slice %51 {offsets = [0, 0], sizes = [32, 250], strides = [1, 1]} : vector<64x250xf32> to vector<32x250xf32>
    %53 = vector.broadcast %2 : vector<32x1xf32> to vector<32x250xf32>
    %54 = arith.addf %52, %53 : vector<32x250xf32>
    %cst_38 = arith.constant 0.000000e+00 : f32
    %55 = vector.broadcast %cst_38 : f32 to vector<32x250xf32>
    %56 = arith.maximumf %54, %55 : vector<32x250xf32>
    %57 = vector.extract_strided_slice %51 {offsets = [32, 0], sizes = [32, 250], strides = [1, 1]} : vector<64x250xf32> to vector<32x250xf32>
    %58 = arith.mulf %47, %4 : vector<8x32xf32>
    %59 = arith.addf %58, %6 : vector<8x32xf32>
    %cst_39 = arith.constant 0.000000e+00 : f32
    %60 = vector.broadcast %cst_39 : f32 to vector<8x32xf32>
    %61 = arith.maximumf %59, %60 : vector<8x32xf32>
    %cst_40 = arith.constant dense<0.000000e+00> : vector<8x250xf32>
    %62 = tpu.matmul %61, %56, %cst_40 {dimension_numbers = #tpu.dot_dimension_numbers<[1], [0], [0], [1], [0, 0, 1, 1], [], []>} : vector<8x32xf32>, vector<32x250xf32>, vector<8x250xf32> -> vector<8x250xf32>
    %cst_41 = arith.constant dense<0xFF800000> : vector<8xf32>
    %63 = vector.multi_reduction <maximumf>, %62, %cst_41 [1] : vector<8x250xf32> to vector<8xf32>
    %64 = vector.shape_cast %63 : vector<8xf32> to vector<8x1xf32>
    %65 = vector.broadcast %64 : vector<8x1xf32> to vector<8x250xf32>
    %66 = arith.subf %62, %65 : vector<8x250xf32>
    %67 = math.exp %66 : vector<8x250xf32>
    %cst_42 = arith.constant dense<0.000000e+00> : vector<8xf32>
    %68 = vector.multi_reduction <add>, %67, %cst_42 [1] : vector<8x250xf32> to vector<8xf32>
    %69 = vector.shape_cast %68 : vector<8xf32> to vector<8x1xf32>
    %70 = tpu.reciprocal %69 : vector<8x1xf32> -> vector<8x1xf32>
    %71 = vector.broadcast %70 : vector<8x1xf32> to vector<8x250xf32>
    %72 = arith.mulf %67, %71 : vector<8x250xf32>
    %cst_43 = arith.constant dense<0.000000e+00> : vector<32x8xf32>
    %73 = tpu.matmul %57, %72, %cst_43 {dimension_numbers = #tpu.dot_dimension_numbers<[1], [1], [0], [0], [0, 0, 1, 0], [], []>} : vector<32x250xf32>, vector<8x250xf32>, vector<32x8xf32> -> vector<32x8xf32>
    %74 = tpu.transpose %73, [1, 0] : vector<32x8xf32> -> vector<8x32xf32>
    %75 = arith.mulf %74, %8 : vector<8x32xf32>
    %76 = arith.addf %47, %75 : vector<8x32xf32>
    %77 = arith.addf %76, %10 : vector<8x32xf32>
    %c1_44 = arith.constant 1 : index
    %c0_45 = arith.constant 0 : index
    %c0_46 = arith.constant 0 : index
    %78 = vector.load %arg7[%c1_44, %c0_45, %c0_46] : memref<2x8x32xf32, #tpu.memory_space<vmem>>, vector<1x8x32xf32>
    %79 = vector.shape_cast %78 : vector<1x8x32xf32> to vector<8x32xf32>
    %80 = vector.shape_cast %77 : vector<8x32xf32> to vector<1x8x32xf32>
    tpu.vector_store %arg7[%c1_44, %c0_45, %c0_46], %80 {strides = array<i32>} : memref<2x8x32xf32, #tpu.memory_space<vmem>>, vector<1x8x32xf32>,
    return
  }
  func.func @transform_0(%arg0: i32) -> (i32, i32, i32) {
    %c0_i32 = arith.constant 0 : i32
    %c0_i32_0 = arith.constant 0 : i32
    %c0_i32_1 = arith.constant 0 : i32
    return %arg0, %c0_i32, %c0_i32_0 : i32, i32, i32
  }
  func.func @transform_1(%arg0: i32) -> (i32, i32, i32) {
    %c0_i32 = arith.constant 0 : i32
    %c0_i32_0 = arith.constant 0 : i32
    %c0_i32_1 = arith.constant 0 : i32
    return %arg0, %c0_i32, %c0_i32_0 : i32, i32, i32
  }
  func.func @transform_2(%arg0: i32) -> (i32, i32) {
    %c0_i32 = arith.constant 0 : i32
    %c0_i32_0 = arith.constant 0 : i32
    %c0_i32_1 = arith.constant 0 : i32
    return %c0_i32, %c0_i32_0 : i32, i32
  }
  func.func @transform_3(%arg0: i32) -> (i32, i32) {
    %c0_i32 = arith.constant 0 : i32
    %c0_i32_0 = arith.constant 0 : i32
    %c0_i32_1 = arith.constant 0 : i32
    return %c0_i32, %c0_i32_0 : i32, i32
  }
  func.func @transform_4(%arg0: i32) -> (i32, i32) {
    %c0_i32 = arith.constant 0 : i32
    %c0_i32_0 = arith.constant 0 : i32
    %c0_i32_1 = arith.constant 0 : i32
    return %c0_i32, %c0_i32_0 : i32, i32
  }
  func.func @transform_5(%arg0: i32) -> (i32, i32, i32) {
    %c0_i32 = arith.constant 0 : i32
    %c0_i32_0 = arith.constant 0 : i32
    %c0_i32_1 = arith.constant 0 : i32
    %c0_i32_2 = arith.constant 0 : i32
    return %c0_i32, %c0_i32_0, %c0_i32_1 : i32, i32, i32
  }
  func.func @transform_6(%arg0: i32) -> (i32, i32, i32) {
    %c0_i32 = arith.constant 0 : i32
    %c0_i32_0 = arith.constant 0 : i32
    %c0_i32_1 = arith.constant 0 : i32
    return %arg0, %c0_i32, %c0_i32_0 : i32, i32, i32
  }
}

</mosaic_0001>

<bundles_post_ra>
// kernel: query_feat_forward.1
= control target key start
LH: loop header
LB: loop body
LE: loop exit
PB: predicated region body
PF: predicated region fallthrough
CT: control target
= control target key end

     0   :  { %s1931_s0 = inlined_call_operand.vmem [shape: f32[2,8,32], index: 0, kind: input, shape index: {}]   ;;  %s1932_s1 = inlined_call_operand.vmem [shape: f32[2,32,256], index: 1, kind: input, shape index: {}]   ;;  %s1933_s2 = inlined_call_operand.vmem [shape: f32[256,250], index: 2, kind: input, shape index: {}]   ;;  %s1934_s3 = inlined_call_operand.vmem [shape: f32[64,32], index: 3, kind: input, shape index: {}]   ;;  %s1935_s4 = inlined_call_operand.vmem [shape: f32[32,1], index: 4, kind: input, shape index: {}]   ;;  %s1936_s5 = inlined_call_operand.vmem [shape: f32[4,8,32], index: 5, kind: input, shape index: {}]   ;;  %s1937_s6 = inlined_call_operand.hbm [shape: f32[2,8,32], index: 6, kind: output, shape index: {}]  }
   0x1   :  { %v25_v0 = vld [vmem:[%s1933_s2 + $0x8] sm:$0xff]  ;;  %v27_v1 = vld [vmem:[%s1933_s2 + $0x18] sm:$0xff]  ;;  %v24_v2 = vld [vmem:[%s1933_s2] sm:$0xff] }
   0x2   :  { %v1382_v3 = vpack.c.bf16 %v27_v1, %v25_v0  ;;  %v26_v4 = vld [vmem:[%s1933_s2 + $0x10] sm:$0xff]  ;;  %v29_v5 = vld [vmem:[%s1933_s2 + $0x28] sm:$0xff]  ;;  %v31_v6 = vld [vmem:[%s1933_s2 + $0x38] sm:$0xff] }
   0x3   :  { %v1393_v7 = vpack.c.bf16 %v26_v4, %v24_v2  ;;  %v1395_v8 = vpack.c.bf16 %v31_v6, %v29_v5  ;;  %v28_v9 = vld [vmem:[%s1933_s2 + $0x20] sm:$0xff]  ;;  %v30_v10 = vld [vmem:[%s1933_s2 + $0x30] sm:$0xff]  ;;  %v33_v11 = vld [vmem:[%s1933_s2 + $0x48] sm:$0xff] }
   0x4   :  { %1127 = vmatprep.subr.bf16.mxu0 %v1382_v3  ;;  %v35_v12 = vld [vmem:[%s1933_s2 + $0x58] sm:$0xff]  ;;  %v1411_v13 = vpack.c.bf16 %v30_v10, %v28_v9  ;;  %v32_v15 = vld [vmem:[%s1933_s2 + $0x40] sm:$0xff]  ;;  %v34_v16 = vld [vmem:[%s1933_s2 + $0x50] sm:$0xff] }
   0x5   :  { %1129 = vmatpush1.bf16.msra.mxu0 %v1393_v7  ;;  %v1414_v14 = vpack.c.bf16 %v35_v12, %v33_v11  ;;  %v37_v17 = vld [vmem:[%s1933_s2 + $0x68] sm:$0xff]  ;;  %v39_v18 = vld [vmem:[%s1933_s2 + $0x78] sm:$0xff]  ;;  %v1429_v19 = vpack.c.bf16 %v34_v16, %v32_v15  ;;  %v36_v21 = vld [vmem:[%s1933_s2 + $0x60] sm:$0xff] }
   0x6   :  { %1131 = vmatprep.subr.bf16.mxu0 %v1395_v8  ;;  %v1432_v20 = vpack.c.bf16 %v39_v18, %v37_v17  ;;  %v38_v22 = vld [vmem:[%s1933_s2 + $0x70] sm:$0xff]  ;;  %v41_v23 = vld [vmem:[%s1933_s2 + $0x88] sm:$0xff]  ;;  %v43_v24 = vld [vmem:[%s1933_s2 + $0x98] sm:$0xff] }
   0x7   :  { %v1447_v25 = vpack.c.bf16 %v38_v22, %v36_v21  ;;  %v1450_v26 = vpack.c.bf16 %v43_v24, %v41_v23  ;;  %v40_v27 = vld [vmem:[%s1933_s2 + $0x80] sm:$0xff]  ;;  %v42_v28 = vld [vmem:[%s1933_s2 + $0x90] sm:$0xff]  ;;  %v45_v29 = vld [vmem:[%s1933_s2 + $0xa8] sm:$0xff] }
   0x8   :  { %v47_v30 = vld [vmem:[%s1933_s2 + $0xb8] sm:$0xff]  ;;  %v1465_v31 = vpack.c.bf16 %v42_v28, %v40_v27  ;;  %v44_v33 = vld [vmem:[%s1933_s2 + $0xa0] sm:$0xff]  ;;  %v46_v34 = vld [vmem:[%s1933_s2 + $0xb0] sm:$0xff] }
   0x9   :  { %1133 = vmatpush1.bf16.msra.mxu0 %v1411_v13  ;;  %v1468_v32 = vpack.c.bf16 %v47_v30, %v45_v29  ;;  %v49_v35 = vld [vmem:[%s1933_s2 + $0xc8] sm:$0xff]  ;;  %v51_v36 = vld [vmem:[%s1933_s2 + $0xd8] sm:$0xff]  ;;  %v1483_v37 = vpack.c.bf16 %v46_v34, %v44_v33  ;;  %v48_v39 = vld [vmem:[%s1933_s2 + $0xc0] sm:$0xff] }
   0xa   :  { %1135 = vmatprep.subr.bf16.mxu0 %v1414_v14  ;;  %v1486_v38 = vpack.c.bf16 %v51_v36, %v49_v35  ;;  %v50_v40 = vld [vmem:[%s1933_s2 + $0xd0] sm:$0xff]  ;;  %v109_v41 = vld [vmem:[%s1932_s1 + $0x8] sm:$0xff]  ;;  %v55_v43 = vld [vmem:[%s1933_s2 + $0xf8] sm:$0xff] }
   0xb   :  { %v53_v42 = vld [vmem:[%s1933_s2 + $0xe8] sm:$0xff]  ;;  %180 = vmatprep.mubr.f32.mxu0 %v109_v41  ;;  %v1504_v44 = vpack.c.bf16 %v50_v40, %v48_v39 }
   0xd   :  { %1137 = vmatpush1.bf16.msra.mxu0 %v1429_v19 }
   0xe   :  { %1139 = vmatprep.subr.bf16.mxu0 %v1432_v20 }
  0x11   :  { %1141 = vmatpush1.bf16.msra.mxu0 %v1447_v25 }
  0x12   :  { %1143 = vmatprep.subr.bf16.mxu0 %v1450_v26 }
  0x15   :  { %1145 = vmatpush1.bf16.msra.mxu0 %v1465_v31 }
  0x16   :  { %1147 = vmatprep.subr.bf16.mxu0 %v1468_v32 }
  0x19   :  { %1149 = vmatpush1.bf16.msra.mxu0 %v1483_v37 }
  0x1a   :  { %11 = vsyncpa [#allocation3], 0  ;;  %1151 = vmatprep.subr.bf16.mxu0 %v1486_v38  ;;  %v1507_v45 = vpack.c.bf16 %v55_v43, %v53_v42  ;;  %v52_v46 = vld [vmem:[%s1933_s2 + $0xe0] sm:$0xff]  ;;  %v54_v47 = vld [vmem:[%s1933_s2 + $0xf0] sm:$0xff]  ;;  %vm205_vm0 = vcmask 261120   ;;  %vm456_vm1 = vcmask 998400  }
  0x1b   :  { %v57_v48 = vld [vmem:[%s1933_s2 + $0x108] sm:$0xff]  ;;  %v59_v49 = vld [vmem:[%s1933_s2 + $0x118] sm:$0xff]  ;;  %v1522_v50 = vpack.c.bf16 %v54_v47, %v52_v46  ;;  %v56_v52 = vld [vmem:[%s1933_s2 + $0x100] sm:$0xff] }
  0x1c   :  { %v1525_v51 = vpack.c.bf16 %v59_v49, %v57_v48  ;;  %v58_v53 = vld [vmem:[%s1933_s2 + $0x110] sm:$0xff]  ;;  %v61_v54 = vld [vmem:[%s1933_s2 + $0x128] sm:$0xff]  ;;  %v63_v55 = vld [vmem:[%s1933_s2 + $0x138] sm:$0xff] }
  0x1d   :  { %1153 = vmatpush1.bf16.msra.mxu0 %v1504_v44  ;;  %v1540_v56 = vpack.c.bf16 %v58_v53, %v56_v52  ;;  %v1543_v57 = vpack.c.bf16 %v63_v55, %v61_v54  ;;  %v60_v58 = vld [vmem:[%s1933_s2 + $0x120] sm:$0xff]  ;;  %v62_v59 = vld [vmem:[%s1933_s2 + $0x130] sm:$0xff]  ;;  %v65_v60 = vld [vmem:[%s1933_s2 + $0x148] sm:$0xff] }
  0x1e   :  { %1155 = vmatprep.subr.bf16.mxu0 %v1507_v45  ;;  %v67_v61 = vld [vmem:[%s1933_s2 + $0x158] sm:$0xff]  ;;  %v1558_v62 = vpack.c.bf16 %v62_v59, %v60_v58  ;;  %v64_v0 = vld [vmem:[%s1933_s2 + $0x140] sm:$0xff]  ;;  %v66_v1 = vld [vmem:[%s1933_s2 + $0x150] sm:$0xff]  ;;  %v1938_v59 = vmov 0.0  }
  0x1f   :  { %v1561_v63 = vpack.c.bf16 %v67_v61, %v65_v60  ;;  %v69_v2 = vld [vmem:[%s1933_s2 + $0x168] sm:$0xff]  ;;  %v71_v4 = vld [vmem:[%s1933_s2 + $0x178] sm:$0xff]  ;;  %v1576_v5 = vpack.c.bf16 %v66_v1, %v64_v0  ;;  %v68_v9 = vld [vmem:[%s1933_s2 + $0x160] sm:$0xff]  ;;  %294 = vmatprep.mubr.f32.mxu1 %v1938_v59  ;;  %v1334_v0 = vmov 0  }
  0x20   :  { %v1579_v6 = vpack.c.bf16 %v71_v4, %v69_v2  ;;  %v70_v10 = vld [vmem:[%s1933_s2 + $0x170] sm:$0xff]  ;;  %v73_v11 = vld [vmem:[%s1933_s2 + $0x188] sm:$0xff]  ;;  %v75_v12 = vld [vmem:[%s1933_s2 + $0x198] sm:$0xff]  ;;  %1295 = vset.pattern.permute.xlu0 %v1334_v0  ;;  %1296 = vset.pattern.permute.xlu1 %v1334_v0 }
  0x21   :  { %1157 = vmatpush1.bf16.msra.mxu0 %v1522_v50  ;;  %v1594_v15 = vpack.c.bf16 %v70_v10, %v68_v9  ;;  %v1597_v16 = vpack.c.bf16 %v75_v12, %v73_v11  ;;  %v72_v17 = vld [vmem:[%s1933_s2 + $0x180] sm:$0xff]  ;;  %v74_v18 = vld [vmem:[%s1933_s2 + $0x190] sm:$0xff]  ;;  %v77_v21 = vld [vmem:[%s1933_s2 + $0x1a8] sm:$0xff] }
  0x22   :  { %1159 = vmatprep.subr.bf16.mxu0 %v1525_v51  ;;  %v79_v22 = vld [vmem:[%s1933_s2 + $0x1b8] sm:$0xff]  ;;  %v1612_v23 = vpack.c.bf16 %v74_v18, %v72_v17  ;;  %v76_v27 = vld [vmem:[%s1933_s2 + $0x1a0] sm:$0xff]  ;;  %v78_v28 = vld [vmem:[%s1933_s2 + $0x1b0] sm:$0xff] }
  0x23   :  { %v1615_v24 = vpack.c.bf16 %v79_v22, %v77_v21  ;;  %v81_v29 = vld [vmem:[%s1933_s2 + $0x1c8] sm:$0xff]  ;;  %v83_v30 = vld [vmem:[%s1933_s2 + $0x1d8] sm:$0xff]  ;;  %v1630_v33 = vpack.c.bf16 %v78_v28, %v76_v27  ;;  %v80_v35 = vld [vmem:[%s1933_s2 + $0x1c0] sm:$0xff] }
  0x24   :  { %v1633_v34 = vpack.c.bf16 %v83_v30, %v81_v29  ;;  %v82_v36 = vld [vmem:[%s1933_s2 + $0x1d0] sm:$0xff]  ;;  %v85_v39 = vld [vmem:[%s1933_s2 + $0x1e8] sm:$0xff]  ;;  %v87_v40 = vld [vmem:[%s1933_s2 + $0x1f8] sm:$0xff] }
  0x25   :  { %1161 = vmatpush1.bf16.msra.mxu0 %v1540_v56  ;;  %v1648_v41 = vpack.c.bf16 %v82_v36, %v80_v35  ;;  %v1651_v42 = vpack.c.bf16 %v87_v40, %v85_v39  ;;  %v84_v43 = vld [vmem:[%s1933_s2 + $0x1e0] sm:$0xff]  ;;  %v86_v46 = vld [vmem:[%s1933_s2 + $0x1f0] sm:$0xff]  ;;  %v111_v49 = vld [vmem:[%s1932_s1 + $0x18] sm:$0xff] }
  0x26   :  { %1163 = vmatprep.subr.bf16.mxu0 %v1543_v57  ;;  %v1660_v47 = vpack.c.bf16 %v86_v46, %v84_v43  ;;  %v108_v48 = vld [vmem:[%s1932_s1] sm:$0xff]  ;;  %v110_v52 = vld [vmem:[%s1932_s1 + $0x10] sm:$0xff]  ;;  %v113_v53 = vld [vmem:[%s1932_s1 + $0x28] sm:$0xff] }
  0x27   :  { %v112_v54 = vld [vmem:[%s1932_s1 + $0x20] sm:$0xff]  ;;  %v115_v55 = vld [vmem:[%s1932_s1 + $0x38] sm:$0xff]  ;;  %v114_v58 = vld [vmem:[%s1932_s1 + $0x30] sm:$0xff] }
  0x28   :  { %v96_v60 = vld [vmem:[%s1935_s4] sm:$0xff]  ;;  %v98_v61 = vld [vmem:[%s1935_s4 + $0x10] sm:$0xff]  ;;  %v97_v1 = vld [vmem:[%s1935_s4 + $0x8] sm:$0xff] }
  0x29   :  { %1165 = vmatpush1.bf16.msra.mxu0 %v1558_v62  ;;  %345 = vperm.xlu0 %1295, %v96_v60   ;;  %v99_v2 = vld [vmem:[%s1935_s4 + $0x18] sm:$0xff]  ;;  %v1702_v30 = vld [vmem:[%s1934_s3] sm:$0xff]  ;;  %v1710_v35 = vld [vmem:[%s1934_s3 + $0x8] sm:$0xff] }
  0x2a   :  { %1167 = vmatprep.subr.bf16.mxu0 %v1561_v63  ;;  %355 = vperm.xlu1 %1296, %v98_v61   ;;  %v1718_v36 = vld [vmem:[%s1934_s3 + $0x10] sm:$0xff]  ;;  %v1726_v39 = vld [vmem:[%s1934_s3 + $0x18] sm:$0xff]  ;;  %v1734_v40 = vld [vmem:[%s1934_s3 + $0x20] sm:$0xff] }
  0x2b   :  { %v1742_v43 = vld [vmem:[%s1934_s3 + $0x28] sm:$0xff]  ;;  %v1750_v46 = vld [vmem:[%s1934_s3 + $0x30] sm:$0xff] }
  0x2d   :  { %1169 = vmatpush1.bf16.msra.mxu0 %v1576_v5  ;;  %350 = vperm.xlu0 %1295, %v97_v1  }
  0x2e   :  { %1171 = vmatprep.subr.bf16.mxu0 %v1579_v6  ;;  %360 = vperm.xlu1 %1296, %v99_v2  }
  0x31   :  { %1173 = vmatpush1.bf16.msra.mxu0 %v1594_v15 }
  0x32   :  { %1175 = vmatprep.subr.bf16.mxu0 %v1597_v16 }
  0x35   :  { %1177 = vmatpush1.bf16.msra.mxu0 %v1612_v23 }
  0x36   :  { %1179 = vmatprep.subr.bf16.mxu0 %v1615_v24 }
  0x39   :  { %1181 = vmatpush1.bf16.msra.mxu0 %v1630_v33 }
  0x3a   :  { %1183 = vmatprep.subr.bf16.mxu0 %v1633_v34 }
  0x3d   :  { %1185 = vmatpush1.bf16.msra.mxu0 %v1648_v41 }
  0x3e   :  { %1187 = vmatprep.subr.bf16.mxu0 %v1651_v42 }
  0x41   :  { %1189 = vmatpush1.bf16.msra.mxu0 %v1660_v47 }
  0x44   :  { %181 = vmatmul.mubr.f32.vlgmr.msra.gmra.mrb[0].mxu0 %v108_v48  ;;  %v1758_v48 = vld [vmem:[%s1934_s3 + $0x38] sm:$0xff] }
  0x45   :  { %186 = vmatprep.mubr.f32.mxu0 %v111_v49 }
  0x48   :  { %187 = vmatmul.mubr.f32.gmra.mrb[2].mxu0 %v110_v52 }
  0x49   :  { %192 = vmatprep.mubr.f32.mxu0 %v113_v53 }
  0x4c   :  { %193 = vmatmul.mubr.f32.gmra.mrb[4].mxu0 %v112_v54 }
  0x4d   :  { %198 = vmatprep.mubr.f32.mxu0 %v115_v55 }
  0x50   :  { %199 = vmatmul.mubr.f32.gmra.mrb[6].mxu0 %v114_v58 }
  0x51   :  { %774 = vmatprep.mubr.f32.mxu0 %v1938_v59 }
  0xa8   :  { %v1763_v49 = vpop.permute.xlu0 %345 }
  0xa9   :  { %1951 = vst [vmem:[#allocation5_spill] sm:$0xff] %v1763_v49  ;;  %v1771_v2 = vpop.permute.xlu1 %355 }
  0xaa   :  { %1953 = vst [vmem:[#allocation7_spill] sm:$0xff] %v1771_v2 }
  0xac   :  { %v1765_v54 = vpop.permute.xlu0 %350 }
  0xad   :  { %1952 = vst [vmem:[#allocation6_spill] sm:$0xff] %v1765_v54 }
 0x117   :  { %v182_v4 = vpop.f32.mrb[0].mxu0 }
 0x118   :  { %v184_v9 = vpop.f32.mrb[1].mxu0 }
 0x11b   :  { %v188_v10 = vpop.f32.mrb[2].mxu0 }
 0x11c   :  { %v1192_v11 = vpack.c.bf16 %v188_v10, %v182_v4  ;;  %v190_v12 = vpop.f32.mrb[3].mxu0 }
 0x11d   :  { %v1190_v17 = vpack.c.bf16 %v190_v12, %v184_v9 }
 0x11f   :  { %v194_v18 = vpop.f32.mrb[4].mxu0  ;;  %1191 = vmatprep.subr.bf16.mxu1 %v1190_v17 }
 0x120   :  { %v196_v21 = vpop.f32.mrb[5].mxu0  ;;  %1193 = vmatpush1.bf16.msra.mxu1 %v1192_v11 }
 0x123   :  { %v200_v22 = vpop.f32.mrb[6].mxu0 }
 0x124   :  { %v1196_v27 = vpack.c.bf16 %v200_v22, %v194_v18  ;;  %v202_v28 = vpop.f32.mrb[7].mxu0  ;;  %v1781_v22 = vld [vmem:[%s1931_s0] sm:$0xff] }
 0x125   :  { %v1194_v29 = vpack.c.bf16 %v202_v28, %v196_v21  ;;  %v1776_v21 = vld [vmem:[%s1936_s5] sm:$0xff]  ;;  %1955 = vst [vmem:[#allocation9_spill] sm:$0xff] %v1781_v22 }
 0x126   :  { %1954 = vst [vmem:[#allocation8_spill] sm:$0xff] %v1776_v21 }
 0x127   :  { %1195 = vmatprep.subr.bf16.mxu1 %v1194_v29 }
 0x128   :  { %1197 = vmatpush1.bf16.msra.mxu1 %v1196_v27 }
 0x12b   :  { %1089 = vmatmul.mubr.msk.f32.vlgmr.msra.gmra.mrb[0].mxu1 %vm205_vm0, %v1702_v30 }
 0x12c   :  { %300 = vmatprep.mubr.f32.mxu1 %v1938_v59 }
 0x12f   :  { %1090 = vmatmul.mubr.msk.f32.gmra.mrb[2].mxu1 %vm205_vm0, %v1710_v35 }
 0x130   :  { %306 = vmatprep.mubr.f32.mxu1 %v1938_v59 }
 0x133   :  { %1091 = vmatmul.mubr.msk.f32.gmra.mrb[4].mxu1 %vm205_vm0, %v1718_v36 }
 0x134   :  { %312 = vmatprep.mubr.f32.mxu1 %v1938_v59 }
 0x137   :  { %1092 = vmatmul.mubr.msk.f32.gmra.mrb[6].mxu1 %vm205_vm0, %v1726_v39 }
 0x138   :  { %318 = vmatprep.mubr.f32.mxu1 %v1938_v59 }
 0x13b   :  { %1093 = vmatmul.mubr.msk.f32.gmra.mrb[8].mxu1 %vm205_vm0, %v1734_v40 }
 0x13c   :  { %324 = vmatprep.mubr.f32.mxu1 %v1938_v59 }
 0x13f   :  { %1094 = vmatmul.mubr.msk.f32.gmra.mrb[10].mxu1 %vm205_vm0, %v1742_v43 }
 0x140   :  { %330 = vmatprep.mubr.f32.mxu1 %v1938_v59 }
 0x143   :  { %1095 = vmatmul.mubr.msk.f32.gmra.mrb[12].mxu1 %vm205_vm0, %v1750_v46 }
 0x144   :  { %336 = vmatprep.mubr.f32.mxu1 %v1938_v59 }
 0x147   :  { %1096 = vmatmul.mubr.msk.f32.gmra.mrb[14].mxu1 %vm205_vm0, %v1758_v48 }
 0x148   :  { %449 = vmatprep.mubr.f32.mxu1 %v1938_v59 }
 0x1fe   :  { %v296_v52 = vpop.f32.mrb[0].mxu1 }
 0x1ff   :  { %v298_v53 = vpop.f32.mrb[1].mxu1  ;;  %v363_v55 = vadd.f32 %v1763_v49, %v296_v52  ;;  %v1785_v52 = vpop.permute.xlu1 %360 }
 0x200   :  { %v364_v58 = vadd.f32 %v1763_v49, %v298_v53  ;;  %1956 = vst [vmem:[#allocation10_spill] sm:$0xff] %v1785_v52 }
 0x201   :  { %v371_v4 = vmax.f32 %v363_v55, 0.0  ;;  %v379_v55 = vmul.f32 %v1781_v22, %v1776_v21 }
 0x202   :  { %v302_v60 = vpop.f32.mrb[2].mxu1  ;;  %v372_v10 = vmax.f32 %v364_v58, 0.0 }
 0x203   :  { %v365_v61 = vadd.f32 %v1765_v54, %v302_v60  ;;  %v304_v0 = vpop.f32.mrb[3].mxu1 }
 0x204   :  { %v366_v1 = vadd.f32 %v1765_v54, %v304_v0 }
 0x205   :  { %v373_v9 = vmax.f32 %v365_v61, 0.0  ;;  %v1793_v61 = vld [vmem:[%s1936_s5 + $0x8] sm:$0xff] }
 0x206   :  { %v374_v11 = vmax.f32 %v366_v1, 0.0  ;;  %v308_v12 = vpop.f32.mrb[4].mxu1  ;;  %1957 = vst [vmem:[#allocation11_spill] sm:$0xff] %v1793_v61 }
 0x207   :  { %v1200_v17 = vpack.c.bf16 %v373_v9, %v371_v4  ;;  %v310_v18 = vpop.f32.mrb[5].mxu1  ;;  %v367_v28 = vadd.f32 %v1771_v2, %v308_v12 }
 0x208   :  { %v1198_v27 = vpack.c.bf16 %v374_v11, %v372_v10  ;;  %v368_v29 = vadd.f32 %v1771_v2, %v310_v18  ;;  %v380_v11 = vadd.f32 %v1793_v61, %v379_v55 }
 0x209   :  { %v375_v1 = vmax.f32 %v367_v28, 0.0 }
 0x20a   :  { %v314_v53 = vpop.f32.mrb[6].mxu1  ;;  %1199 = vmatprep.subr.bf16.mxu1 %v1198_v27  ;;  %v376_v9 = vmax.f32 %v368_v29, 0.0  ;;  %v381_v27 = vmax.f32 %v380_v11, 0.0 }
 0x20b   :  { %v369_v58 = vadd.f32 %v1785_v52, %v314_v53  ;;  %v316_v60 = vpop.f32.mrb[7].mxu1  ;;  %1201 = vmatpush1.bf16.msra.mxu1 %v1200_v17 }
 0x20c   :  { %v370_v0 = vadd.f32 %v1785_v52, %v316_v60 }
 0x20d   :  { %v377_v4 = vmax.f32 %v369_v58, 0.0 }
 0x20e   :  { %v378_v10 = vmax.f32 %v370_v0, 0.0  ;;  %v320_v17 = vpop.f32.mrb[8].mxu1 }
 0x20f   :  { %v1204_v12 = vpack.c.bf16 %v377_v4, %v375_v1  ;;  %v322_v53 = vpop.f32.mrb[9].mxu1 }
 0x210   :  { %v1202_v18 = vpack.c.bf16 %v378_v10, %v376_v9 }
 0x212   :  { %1203 = vmatprep.subr.bf16.mxu1 %v1202_v18  ;;  %v326_v59 = vpop.f32.mrb[10].mxu1 }
 0x213   :  { %1205 = vmatpush1.bf16.msra.mxu1 %v1204_v12  ;;  %v328_v60 = vpop.f32.mrb[11].mxu1 }
 0x216   :  { %1097 = vmatmul.mubr.msk.f32.vlgmr.msra.gmra.mrb[16].mxu1 %vm205_vm0, %v381_v27  ;;  %v332_v28 = vpop.f32.mrb[12].mxu1 }
 0x217   :  { %1099 = vmatprep.mubr.msk.f32.mxu1 %vm456_vm1, %v322_v53  ;;  %v334_v58 = vpop.f32.mrb[13].mxu1 }
 0x21a   :  { %v338_v29 = vpop.f32.mrb[14].mxu1 }
 0x21b   :  { %v340_v0 = vpop.f32.mrb[15].mxu1 }
 0x2e9   :  { %v451_v22 = vpop.f32.mrb[16].mxu1 }
 0x2ea   :  { %v453_v55 = vpop.f32.mrb[17].mxu1 }
 0x2eb   :  { %v457_v1 = vsel %vm456_vm1, %v453_v55, -inf }
 0x2ec   :  { %v458_v4 = vmax.f32 %v451_v22, %v457_v1 }
 0x2ee   :  { %459 = vmax.xlane.f32.xlu0 %v458_v4 }
 0x37b   :  { %v460_v9 = vpop.xlane.xlu0 %459 }
 0x37c   :  { %v461_v10 = vsub.f32 %v451_v22, %v460_v9  ;;  %v462_v11 = vsub.f32 %v453_v55, %v460_v9  ;;  %v1963_v55 = vld [vmem:[#allocation10_spill] sm:$0xff] }
 0x37e   :  { %v463_v12 = vmul.f32 1.442695, %v461_v10  ;;  %v465_v18 = vmul.f32 1.442695, %v462_v11 }
 0x380   :  { %1297 = vpow2.f32 %v463_v12 }
 0x381   :  { %1299 = vpow2.f32 %v465_v18 }
 0x38a   :  { %v1298_v27 = vpop.eup %1297 }
 0x38b   :  { %v1300_v53 = vpop.eup %1299 }
 0x38c   :  { %v467_v61 = vsel %vm456_vm1, %v1300_v53, 0.0 }
 0x38d   :  { %v468_v52 = vadd.f32 %v1298_v27, %v467_v61 }
 0x38f   :  { %469 = vadd.xlane.f32.xlu1 %v468_v52  ;;  %v1892_v52 = vld [vmem:[%s1931_s0 + $0x8] sm:$0xff] }
 0x41c   :  { %v470_v21 = vpop.xlane.xlu1 %469 }
 0x41d   :  { %1301 = vrcp.f32 %v470_v21 }
 0x427   :  { %v1302_v2 = vpop.eup %1301 }
 0x428   :  { %v473_v54 = vmul.f32 %v1302_v2, %v1300_v53  ;;  %v472_v49 = vmul.f32 %v1302_v2, %v1298_v27  ;;  %v1964_v27 = vld [vmem:[#allocation11_spill] sm:$0xff] }
 0x42a   :  { %1098 = vmatprep.subr.msk.mxu1 %vm456_vm1, %v473_v54 }
 0x42b   :  { %490 = vmatpush1.xpose.msra.mxu1 %v472_v49 }
 0x42c   :  { %1207 = vmatprep.subr.bf16.mxu1 %v1382_v3  ;;  %v1105_v3 = vld [vmem:[%s1932_s1 + $0x48] sm:$0xff] }
 0x42e   :  { %554 = vmatmul.mubr.f32.vlgmr.msra.gmra.mrb[18].mxu1 %v320_v17  ;;  %v1961_v17 = vld [vmem:[#allocation7_spill] sm:$0xff] }
 0x42f   :  { %1100 = vmatprep.mubr.msk.f32.mxu1 %vm456_vm1, %v328_v60  ;;  %1209 = vmatpush1.bf16.msra.mxu1 %v1393_v7  ;;  %v1104_v7 = vld [vmem:[%s1932_s1 + $0x40] sm:$0xff] }
 0x430   :  { %1211 = vmatprep.subr.bf16.mxu1 %v1395_v8  ;;  %v1107_v8 = vld [vmem:[%s1932_s1 + $0x58] sm:$0xff] }
 0x432   :  { %559 = vmatmul.mubr.f32.gmra.mrb[20].mxu1 %v326_v59 }
 0x433   :  { %1101 = vmatprep.mubr.msk.f32.mxu1 %vm456_vm1, %v334_v58  ;;  %1213 = vmatpush1.bf16.msra.mxu1 %v1411_v13  ;;  %v1106_v13 = vld [vmem:[%s1932_s1 + $0x50] sm:$0xff] }
 0x434   :  { %1215 = vmatprep.subr.bf16.mxu1 %v1414_v14  ;;  %v1109_v14 = vld [vmem:[%s1932_s1 + $0x68] sm:$0xff] }
 0x436   :  { %564 = vmatmul.mubr.f32.gmra.mrb[22].mxu1 %v332_v28 }
 0x437   :  { %1102 = vmatprep.mubr.msk.f32.mxu1 %vm456_vm1, %v340_v0  ;;  %1217 = vmatpush1.bf16.msra.mxu1 %v1429_v19  ;;  %v1108_v19 = vld [vmem:[%s1932_s1 + $0x60] sm:$0xff] }
 0x438   :  { %1219 = vmatprep.subr.bf16.mxu1 %v1432_v20  ;;  %v1111_v20 = vld [vmem:[%s1932_s1 + $0x78] sm:$0xff] }
 0x43a   :  { %569 = vmatmul.mubr.f32.gmra.mrb[24].mxu1 %v338_v29  ;;  %v1962_v29 = vld [vmem:[#allocation8_spill] sm:$0xff] }
 0x43b   :  { %1221 = vmatpush1.bf16.msra.mxu1 %v1447_v25  ;;  %685 = vmatprep.mubr.f32.mxu1 %v1105_v3  ;;  %v1110_v25 = vld [vmem:[%s1932_s1 + $0x70] sm:$0xff]  ;;  %v839_v0 = vmul.f32 %v1892_v52, %v1962_v29 }
 0x43c   :  { %1223 = vmatprep.subr.bf16.mxu1 %v1450_v26  ;;  %v1958_v26 = vmov 0.0  }
 0x43d   :  { %v840_v53 = vadd.f32 %v1964_v27, %v839_v0 }
 0x43f   :  { %1225 = vmatpush1.bf16.msra.mxu1 %v1465_v31 }
 0x440   :  { %1227 = vmatprep.subr.bf16.mxu1 %v1468_v32 }
 0x443   :  { %1229 = vmatpush1.bf16.msra.mxu1 %v1483_v37 }
 0x444   :  { %1231 = vmatprep.subr.bf16.mxu1 %v1486_v38 }
 0x447   :  { %1233 = vmatpush1.bf16.msra.mxu1 %v1504_v44 }
 0x448   :  { %1235 = vmatprep.subr.bf16.mxu1 %v1507_v45 }
 0x44b   :  { %1237 = vmatpush1.bf16.msra.mxu1 %v1522_v50 }
 0x44c   :  { %1239 = vmatprep.subr.bf16.mxu1 %v1525_v51 }
 0x44f   :  { %1241 = vmatpush1.bf16.msra.mxu1 %v1540_v56 }
 0x450   :  { %1243 = vmatprep.subr.bf16.mxu1 %v1543_v57 }
 0x453   :  { %1245 = vmatpush1.bf16.msra.mxu1 %v1558_v62 }
 0x454   :  { %1247 = vmatprep.subr.bf16.mxu1 %v1561_v63 }
 0x457   :  { %1249 = vmatpush1.bf16.msra.mxu1 %v1576_v5 }
 0x458   :  { %1251 = vmatprep.subr.bf16.mxu1 %v1579_v6 }
 0x45b   :  { %1253 = vmatpush1.bf16.msra.mxu1 %v1594_v15 }
 0x45c   :  { %1255 = vmatprep.subr.bf16.mxu1 %v1597_v16 }
 0x45f   :  { %1257 = vmatpush1.bf16.msra.mxu1 %v1612_v23 }
 0x460   :  { %1259 = vmatprep.subr.bf16.mxu1 %v1615_v24 }
 0x463   :  { %1261 = vmatpush1.bf16.msra.mxu1 %v1630_v33 }
 0x464   :  { %1263 = vmatprep.subr.bf16.mxu1 %v1633_v34 }
 0x467   :  { %1265 = vmatpush1.bf16.msra.mxu1 %v1648_v41 }
 0x468   :  { %1267 = vmatprep.subr.bf16.mxu1 %v1651_v42 }
 0x46b   :  { %1269 = vmatpush1.bf16.msra.mxu1 %v1660_v47  ;;  %v1959_v47 = vld [vmem:[#allocation5_spill] sm:$0xff] }
 0x46e   :  { %686 = vmatmul.mubr.f32.vlgmr.msra.gmra.mrb[26].mxu1 %v1104_v7 }
 0x46f   :  { %691 = vmatprep.mubr.f32.mxu1 %v1107_v8 }
 0x472   :  { %692 = vmatmul.mubr.f32.gmra.mrb[28].mxu1 %v1106_v13 }
 0x473   :  { %697 = vmatprep.mubr.f32.mxu1 %v1109_v14  ;;  %v841_v14 = vmax.f32 %v840_v53, 0.0 }
 0x476   :  { %698 = vmatmul.mubr.f32.gmra.mrb[30].mxu1 %v1108_v19 }
 0x477   :  { %703 = vmatprep.mubr.f32.mxu1 %v1111_v20 }
 0x47a   :  { %704 = vmatmul.mubr.f32.gmra.mrb[32].mxu1 %v1110_v25 }
 0x47b   :  { %816 = vmatprep.mubr.f32.mxu1 %v1958_v26 }
 0x501   :  { %v555_v31 = vpop.f32.mrb[18].mxu1 }
 0x502   :  { %574 = vxpose.xlu1.b32.start [1/4] (short) (narrow) %v555_v31, 8  ;;  %v557_v32 = vpop.f32.mrb[19].mxu1 }
 0x505   :  { %v560_v37 = vpop.f32.mrb[20].mxu1 }
 0x506   :  { %575 = vxpose.xlu1.b32.cont [2/4] (short) (narrow) %v560_v37, 8  ;;  %v562_v38 = vpop.f32.mrb[21].mxu1 }
 0x509   :  { %v565_v44 = vpop.f32.mrb[22].mxu1 }
 0x50a   :  { %576 = vxpose.xlu1.b32.cont [3/4] (short) (narrow) %v565_v44, 8  ;;  %v567_v45 = vpop.f32.mrb[23].mxu1 }
 0x50d   :  { %v570_v50 = vpop.f32.mrb[24].mxu1 }
 0x50e   :  { %577 = vxpose.xlu1.b32.end [4/4] (short) (narrow) %v570_v50, 8  ;;  %v572_v51 = vpop.f32.mrb[25].mxu1 }
 0x541   :  { %v687_v56 = vpop.f32.mrb[26].mxu1 }
 0x542   :  { %v689_v57 = vpop.f32.mrb[27].mxu1 }
 0x545   :  { %v693_v62 = vpop.f32.mrb[28].mxu1 }
 0x546   :  { %v1272_v63 = vpack.c.bf16 %v693_v62, %v687_v56  ;;  %v695_v5 = vpop.f32.mrb[29].mxu1 }
 0x547   :  { %v1270_v6 = vpack.c.bf16 %v695_v5, %v689_v57 }
 0x549   :  { %1271 = vmatprep.subr.bf16.mxu0 %v1270_v6  ;;  %1286 = vmatprep.subr.bf16.mxu1 %v1270_v6  ;;  %v699_v15 = vpop.f32.mrb[30].mxu1 }
 0x54a   :  { %1273 = vmatpush1.bf16.msra.mxu0 %v1272_v63  ;;  %1288 = vmatpush1.bf16.msra.mxu1 %v1272_v63  ;;  %v701_v16 = vpop.f32.mrb[31].mxu1 }
 0x54d   :  { %v705_v23 = vpop.f32.mrb[32].mxu1 }
 0x54e   :  { %v1276_v24 = vpack.c.bf16 %v705_v23, %v699_v15  ;;  %v707_v33 = vpop.f32.mrb[33].mxu1 }
 0x54f   :  { %v1274_v34 = vpack.c.bf16 %v707_v33, %v701_v16 }
 0x551   :  { %1275 = vmatprep.subr.bf16.mxu0 %v1274_v34  ;;  %1287 = vmatprep.subr.bf16.mxu1 %v1274_v34  ;;  %v1087_v34 = vld [vmem:[%s1936_s5 + $0x10] sm:$0xff] }
 0x552   :  { %1277 = vmatpush1.bf16.msra.mxu0 %v1276_v24  ;;  %1289 = vmatpush1.bf16.msra.mxu1 %v1276_v24 }
 0x555   :  { %1112 = vmatmul.mubr.msk.f32.vlgmr.msra.gmra.mrb[8].mxu0 %vm205_vm0, %v1702_v30  ;;  %1119 = vmatmul.mubr.msk.f32.vlgmr.msra.gmra.mrb[34].mxu1 %vm205_vm0, %v1758_v48 }
 0x556   :  { %780 = vmatprep.mubr.f32.mxu0 %v1958_v26 }
 0x559   :  { %1113 = vmatmul.mubr.msk.f32.gmra.mrb[10].mxu0 %vm205_vm0, %v1710_v35 }
 0x55a   :  { %786 = vmatprep.mubr.f32.mxu0 %v1958_v26 }
 0x55d   :  { %1114 = vmatmul.mubr.msk.f32.gmra.mrb[12].mxu0 %vm205_vm0, %v1718_v36  ;;  %v1960_v36 = vld [vmem:[#allocation6_spill] sm:$0xff] }
 0x55e   :  { %792 = vmatprep.mubr.f32.mxu0 %v1958_v26 }
 0x561   :  { %1115 = vmatmul.mubr.msk.f32.gmra.mrb[14].mxu0 %vm205_vm0, %v1726_v39 }
 0x562   :  { %798 = vmatprep.mubr.f32.mxu0 %v1958_v26 }
 0x565   :  { %1116 = vmatmul.mubr.msk.f32.gmra.mrb[16].mxu0 %vm205_vm0, %v1734_v40 }
 0x566   :  { %804 = vmatprep.mubr.f32.mxu0 %v1958_v26 }
 0x569   :  { %1117 = vmatmul.mubr.msk.f32.gmra.mrb[18].mxu0 %vm205_vm0, %v1742_v43 }
 0x56a   :  { %810 = vmatprep.mubr.f32.mxu0 %v1958_v26 }
 0x56d   :  { %1118 = vmatmul.mubr.msk.f32.gmra.mrb[20].mxu0 %vm205_vm0, %v1750_v46 }
 0x56e   :  { %909 = vmatprep.mubr.f32.mxu0 %v1958_v26 }
 0x628   :  { %v776_v41 = vpop.f32.mrb[8].mxu0  ;;  %v818_v6 = vpop.f32.mrb[34].mxu1 }
 0x629   :  { %v778_v42 = vpop.f32.mrb[9].mxu0  ;;  %v823_v59 = vadd.f32 %v776_v41, %v1959_v47  ;;  %v820_v15 = vpop.f32.mrb[35].mxu1 }
 0x62a   :  { %v824_v30 = vadd.f32 %v778_v42, %v1959_v47  ;;  %v590_v41 = vpop.trf.xlu1  ;;  %v1088_v47 = vld [vmem:[%s1936_s5 + $0x18] sm:$0xff]  ;;  %s1335_s5 = smov [#allocation2]  }
 0x62b   :  { %v831_v43 = vmax.f32 %v823_v59, 0.0  ;;  %v606_v42 = vmul.f32 %v1087_v34, %v590_v41  ;;  %v1965_v59 = vld [vmem:[#allocation9_spill] sm:$0xff]  ;;  %s1075_s17 = sshll.u32 %s1335_s5, 4  ;;  %s1076_s17 = int_to_ptr.vmem [resolvable:$true] %s1075_s17 }
 0x62c   :  { %v782_v35 = vpop.f32.mrb[10].mxu0  ;;  %v832_v54 = vmax.f32 %v824_v30, 0.0  ;;  %s1309_s3 = scalar_lea.vmem %s1076_s17, 256  ;;  %p1314_p1 = scmp.lt.s32.totalorder %s1076_s17, %s1076_s17 }
 0x62d   :  { %v825_v39 = vadd.f32 %v782_v35, %v1960_v36  ;;  %v784_v40 = vpop.f32.mrb[11].mxu0  ;;  %v607_v30 = vadd.f32 %v606_v42, %v1965_v59  ;;  %p1310_p0 = scmp.ne.s32.totalorder %s1076_s17, %s1309_s3  ;;  %p1315_p2 = scmp.lt.s32.totalorder %s1309_s3, %s1309_s3 }
 0x62e   :  { %v826_v48 = vadd.f32 %v784_v40, %v1960_v36 }
 0x62f   :  { %v833_v49 = vmax.f32 %v825_v39, 0.0  ;;  %v608_v35 = vadd.f32 %v1088_v47, %v607_v30  ;;  %p1316_p3 = por %p1315_p2, %p1314_p1 }
 0x630   :  { %v834_v2 = vmax.f32 %v826_v48, 0.0  ;;  %v788_v21 = vpop.f32.mrb[12].mxu0 }
 0x631   :  { %v1280_v46 = vpack.c.bf16 %v833_v49, %v831_v43  ;;  %v790_v22 = vpop.f32.mrb[13].mxu0  ;;  %v827_v60 = vadd.f32 %v788_v21, %v1961_v17  ;;  %609 = vst.msk [vmem:[#allocation2] sm:$0xff] %vm205_vm0, %v608_v35  ;;  %p1317_p4 = pnand %p1316_p3, %p1310_p0 }
 0x632   :  { %v1278_v61 = vpack.c.bf16 %v834_v2, %v832_v54  ;;  %v828_v28 = vadd.f32 %v790_v22, %v1961_v17 }
 0x633   :  { %v835_v10 = vmax.f32 %v827_v60, 0.0 }
 0x634   :  { %v794_v58 = vpop.f32.mrb[14].mxu0  ;;  %1279 = vmatprep.subr.bf16.mxu0 %v1278_v61  ;;  %v836_v12 = vmax.f32 %v828_v28, 0.0 }
 0x635   :  { %v829_v1 = vadd.f32 %v794_v58, %v1963_v55  ;;  %v796_v4 = vpop.f32.mrb[15].mxu0  ;;  %1281 = vmatpush1.bf16.msra.mxu0 %v1280_v46 }
 0x636   :  { %v830_v9 = vadd.f32 %v796_v4, %v1963_v55 }
 0x637   :  { %v837_v11 = vmax.f32 %v829_v1, 0.0 }
 0x638   :  { %v838_v18 = vmax.f32 %v830_v9, 0.0  ;;  %v800_v3 = vpop.f32.mrb[16].mxu0 }
 0x639   :  { %v1284_v7 = vpack.c.bf16 %v837_v11, %v835_v10  ;;  %v802_v8 = vpop.f32.mrb[17].mxu0 }
 0x63a   :  { %v1282_v13 = vpack.c.bf16 %v838_v18, %v836_v12 }
 0x63c   :  { %1283 = vmatprep.subr.bf16.mxu0 %v1282_v13  ;;  %v806_v19 = vpop.f32.mrb[18].mxu0 }
 0x63d   :  { %1285 = vmatpush1.bf16.msra.mxu0 %v1284_v7  ;;  %v808_v20 = vpop.f32.mrb[19].mxu0 }
 0x640   :  { %1120 = vmatmul.mubr.msk.f32.vlgmr.msra.gmra.mrb[22].mxu0 %vm205_vm0, %v841_v14  ;;  %v812_v25 = vpop.f32.mrb[20].mxu0 }
 0x641   :  { %v814_v26 = vpop.f32.mrb[21].mxu0  ;;  %1122 = vmatprep.mubr.msk.f32.mxu0 %vm456_vm1, %v802_v8 }
 0x713   :  { %v911_v31 = vpop.f32.mrb[22].mxu0 }
 0x714   :  { %v913_v32 = vpop.f32.mrb[23].mxu0 }
 0x715   :  { %v916_v37 = vsel %vm456_vm1, %v913_v32, -inf }
 0x716   :  { %v917_v38 = vmax.f32 %v911_v31, %v916_v37 }
 0x718   :  { %918 = vmax.xlane.f32.xlu0 %v917_v38 }
 0x7a5   :  { %v919_v44 = vpop.xlane.xlu0 %918 }
 0x7a6   :  { %v920_v45 = vsub.f32 %v911_v31, %v919_v44  ;;  %v921_v50 = vsub.f32 %v913_v32, %v919_v44 }
 0x7a8   :  { %v922_v51 = vmul.f32 1.442695, %v920_v45  ;;  %v924_v56 = vmul.f32 1.442695, %v921_v50 }
 0x7aa   :  { %1303 = vpow2.f32 %v922_v51 }
 0x7ab   :  { %1305 = vpow2.f32 %v924_v56 }
 0x7b4   :  { %v1304_v57 = vpop.eup %1303 }
 0x7b5   :  { %v1306_v62 = vpop.eup %1305 }
 0x7b6   :  { %v926_v63 = vsel %vm456_vm1, %v1306_v62, 0.0 }
 0x7b7   :  { %v927_v5 = vadd.f32 %v1304_v57, %v926_v63 }
 0x7b9   :  { %928 = vadd.xlane.f32.xlu0 %v927_v5 }
 0x846   :  { %v929_v16 = vpop.xlane.xlu0 %928 }
 0x847   :  { %1307 = vrcp.f32 %v929_v16 }
 0x851   :  { %v1308_v23 = vpop.eup %1307 }
 0x852   :  { %v932_v24 = vmul.f32 %v1308_v23, %v1306_v62  ;;  %v931_v33 = vmul.f32 %v1308_v23, %v1304_v57 }
 0x854   :  { %1121 = vmatprep.subr.msk.mxu0 %vm456_vm1, %v932_v24 }
 0x855   :  { %949 = vmatpush1.xpose.msra.mxu0 %v931_v33 }
 0x858   :  { %1013 = vmatmul.mubr.f32.vlgmr.msra.gmra.mrb[24].mxu0 %v800_v3 }
 0x859   :  { %1123 = vmatprep.mubr.msk.f32.mxu0 %vm456_vm1, %v808_v20 }
 0x85c   :  { %1018 = vmatmul.mubr.f32.gmra.mrb[26].mxu0 %v806_v19 }
 0x85d   :  { %1124 = vmatprep.mubr.msk.f32.mxu0 %vm456_vm1, %v814_v26 }
 0x860   :  { %1023 = vmatmul.mubr.f32.gmra.mrb[28].mxu0 %v812_v25 }
 0x861   :  { %1125 = vmatprep.mubr.msk.f32.mxu0 %vm456_vm1, %v820_v15 }
 0x864   :  { %1028 = vmatmul.mubr.f32.gmra.mrb[30].mxu0 %v818_v6 }
 0x92b   :  { %v1014_v36 = vpop.f32.mrb[24].mxu0 }
 0x92c   :  { %1033 = vxpose.xlu0.b32.start [1/4] (short) (narrow) %v1014_v36, 8  ;;  %v1016_v39 = vpop.f32.mrb[25].mxu0 }
 0x92f   :  { %v1019_v40 = vpop.f32.mrb[26].mxu0 }
 0x930   :  { %1034 = vxpose.xlu0.b32.cont [2/4] (short) (narrow) %v1019_v40, 8  ;;  %v1021_v48 = vpop.f32.mrb[27].mxu0 }
 0x933   :  { %v1024_v43 = vpop.f32.mrb[28].mxu0 }
 0x934   :  { %1035 = vxpose.xlu0.b32.cont [3/4] (short) (narrow) %v1024_v43, 8  ;;  %v1026_v49 = vpop.f32.mrb[29].mxu0 }
 0x937   :  { %v1029_v54 = vpop.f32.mrb[30].mxu0 }
 0x938   :  { %v1031_v2 = vpop.f32.mrb[31].mxu0  ;;  %1036 = vxpose.xlu0.b32.end [4/4] (short) (narrow) %v1029_v54, 8 }
 0x9ac   :  { %v1049_v21 = vpop.trf.xlu0 }
 0x9ad   :  { %v1065_v46 = vmul.f32 %v1087_v34, %v1049_v21 }
 0x9af   :  { %v1066_v22 = vadd.f32 %v1892_v52, %v1065_v46 }
 0x9b1   :  { %v1067_v61 = vadd.f32 %v1088_v47, %v1066_v22 }
 0x9b3   :  { %1069 = vst.msk [vmem:[#allocation2 + $0x8] sm:$0xff] %vm205_vm0, %v1067_v61 }
 0x9b4   :  { %1320 = shalt.err (!%p1317_p4)
}
 0x9b5   :  { %s1321_s20 = scalar_lea.hbm %s1937_s6, 256 }
 0x9b6   :  { %p1322_p5 = scmp.ne.s32.totalorder %s1937_s6, %s1321_s20  ;;  %p1325_p6 = scmp.lt.u32.totalorder %s1321_s20, %s1937_s6 }
 0x9b8   :  { %p1327_p7 = pnand %p1325_p6, %p1322_p5 }
 0x9ba   :  { %1330 = shalt.err (!%p1327_p7)
}
 0x9bb   :  { %s1336_s25 = smov 128   ;;  %s1337_s26 = smov 8  }
 0x9bc   :  { %1081 = dma.vmem_to_hbm [thread:$0]  %s1076_s17, 256, %s1937_s6, [#allocation3], %s1336_s25, %s1336_s25, %s1337_s26  }
 0x9bd   :  { %1331 = dma.done.wait [#allocation3], 256  }
 0x9be   :  { %1332 = vsyncadd [#allocation3], 4294967040 }
 0x9bf   :  { %1085 = vsyncpa [#allocation3], 1 }

</bundles_post_ra>
